<compile_context>
chip_gen: v5e
topology: v5e:2x2
jax: 0.10.0
libtpu: 0.0.40
codegen_flags: <defaults>
</compile_context>

<pallas_src>
import functools

import numpy as np
import jax
import jax.numpy as jnp
from jax.experimental import pallas as pl
from jax.experimental.pallas import tpu as pltpu


def bicubic_matrix(out_size: int, in_size: int) -> jnp.ndarray:
    """Row-stochastic (out_size, in_size) matrix reproducing PyTorch bicubic
    interpolation with align_corners=True (A = -0.75). Built with numpy so it
    is a compile-time constant."""
    A = -0.75

    def cubic(t):
        t = np.abs(t)
        w1 = ((A + 2.0) * t - (A + 3.0)) * t * t + 1.0            # |t| <= 1
        w2 = (((t - 5.0) * t + 8.0) * t - 4.0) * A                # 1 < |t| < 2
        return np.where(t <= 1.0, w1, np.where(t < 2.0, w2, 0.0))

    i = np.arange(out_size, dtype=np.float64)
    if out_size > 1:
        src = i * (in_size - 1) / (out_size - 1)
    else:
        src = np.zeros_like(i)
    i0 = np.floor(src)
    t = src - i0                                                   # (out,)

    offs = np.array([-1.0, 0.0, 1.0, 2.0], dtype=np.float64)       # 4 taps
    w = cubic(t[:, None] - offs[None, :])                          # (out, 4)
    idx = np.clip(i0[:, None] + offs[None, :], 0, in_size - 1).astype(np.int64)

    m = np.zeros((out_size, in_size), dtype=np.float64)
    rows = np.repeat(np.arange(out_size), 4)
    np.add.at(m, (rows, idx.reshape(-1)), w.reshape(-1))           # clamp-accumulate
    return jnp.asarray(m.astype(np.float32))


def _pick_block(nc: int, hx: int, wx: int,
                itemsize: int = 4,
                vmem_budget: int = 16 << 20,
                max_unroll: int = 16) -> int:
    """Largest divisor of nc whose double-buffered x block stays well under the
    VMEM budget (conservative for v7x's 64 MiB), capped so the static in-kernel
    unroll stays small. Prefer leaving >=2 grid steps (v7x has 2 TensorCores)
    when the flattened matmul still has >= 256 rows."""
    cap = max(1, min(max_unroll, vmem_budget // (2 * hx * wx * itemsize)))
    divs = [d for d in range(1, nc + 1) if nc % d == 0 and d <= cap]
    best = divs[-1]
    for d in reversed(divs):
        if nc // d >= 2 and d * hx >= 256:
            return d
    return best


def _bp_loss_kernel(x_ref, y_ref, wwt_ref, wh_ref, out_ref):
    # x_ref: (B*Hx, Wx) flattened block of B source images
    # y_ref: (B, Hy, Wy) matching target block
    B, Hy, Wy = y_ref.shape
    BHx, Wx = x_ref.shape
    Hx = BHx // B

    # (1) W-resize for the whole block as ONE flattened MXU matmul, M = B*Hx.
    t = jnp.dot(x_ref[...], wwt_ref[...],
                preferred_element_type=jnp.float32)                # (B*Hx, Wy)

    # (2) H-resize per image (small, ~25% of the FLOPs), elementwise |diff|
    #     accumulated on the VPU; no cross-lane reduction in the kernel.
    wh = wh_ref[...]                                               # (Hy, Hx)
    acc = jnp.zeros((Hy, Wy), jnp.float32)
    for b in range(B):                                             # static unroll (B small)
        d = jnp.dot(wh, t[b * Hx:(b + 1) * Hx, :],
                    preferred_element_type=jnp.float32)            # (Hy, Wy)
        acc = acc + jnp.abs(d - y_ref[b])

    out_ref[0] = acc                                               # per-block partial


@functools.partial(jax.jit, static_argnames=("scale_factor",))
def back_projection_loss(x, y, scale_factor: int = 4):
    N, C, Hx, Wx = x.shape
    Ny, Cy, Hy, Wy = y.shape
    assert Hx == Hy * scale_factor
    assert Wx == Wy * scale_factor

    if x.dtype != jnp.float32:
        x = x.astype(jnp.float32)
    if y.dtype != jnp.float32:
        y = y.astype(jnp.float32)

    wh = bicubic_matrix(Hy, Hx)            # (Hy, Hx)
    wwt = bicubic_matrix(Wy, Wx).T         # (Wx, Wy)

    NC = N * C
    B = _pick_block(NC, Hx, Wx)
    num_blocks = NC // B

    xr = x.reshape(NC * Hx, Wx)            # contiguous collapse -> free
    yr = y.reshape(NC, Hy, Wy)

    partials = pl.pallas_call(
        _bp_loss_kernel,
        out_shape=jax.ShapeDtypeStruct((num_blocks, Hy, Wy), jnp.float32),
        grid_spec=pltpu.PrefetchScalarGridSpec(
            num_scalar_prefetch=0,
            grid=(num_blocks,),
            in_specs=[
                pl.BlockSpec((B * Hx, Wx), lambda i: (i, 0)),
                pl.BlockSpec((B, Hy, Wy), lambda i: (i, 0, 0)),
                pl.BlockSpec((Wx, Wy), lambda i: (0, 0)),
                pl.BlockSpec((Hy, Hx), lambda i: (0, 0)),
            ],
            out_specs=pl.BlockSpec((1, Hy, Wy), lambda i: (i, 0, 0)),
        ),
        compiler_params=pltpu.CompilerParams(
            # per-block partial sums -> no carried state -> grid can shard
            # across TensorCores on v7x.
            dimension_semantics=("parallel",),
        ),
    )(xr, yr, wwt, wh)

    # F.l1_loss default reduction='mean'
    return jnp.sum(partials) / (NC * Hy * Wy)


if __name__ == "__main__":
    key = jax.random.PRNGKey(0)
    kx, ky = jax.random.split(key)

    scale = 4
    N, C, Hy, Wy = 2, 4, 16, 16
    x = jax.random.normal(kx, (N, C, Hy * scale, Wy * scale), dtype=jnp.float32)
    y = jax.random.normal(ky, (N, C, Hy, Wy), dtype=jnp.float32)

    loss = back_projection_loss(x, y, scale_factor=scale)
    jax.block_until_ready(loss)
    print("KERNEL_OK")
</pallas_src>

<mosaic_0001>
module attributes {stable_mosaic.version = 11 : i64} {
  func.func @_bp_loss_kernel(%arg0: i32, %arg1: memref<256x64xf32, #tpu.memory_space<vmem>>, %arg2: memref<4x16x16xf32, #tpu.memory_space<vmem>>, %arg3: memref<64x16xf32, #tpu.memory_space<vmem>>, %arg4: memref<16x64xf32, #tpu.memory_space<vmem>>, %arg5: memref<1x16x16xf32, #tpu.memory_space<vmem>>) attributes {dimension_semantics = [#tpu.dimension_semantics<parallel>], iteration_bounds = array<i64: 2>, scalar_prefetch = 0 : i64, scratch_operands = 0 : i64, tpu.core_type = #tpu.core_type<tc>, window_params = [{transform_indices = @transform_0, window_bounds = array<i64: 256, 64>}, {transform_indices = @transform_1, window_bounds = array<i64: 4, 16, 16>}, {pipeline_mode = #tpu.pipeline_mode<synchronous>, transform_indices = @transform_2, window_bounds = array<i64: 64, 16>}, {pipeline_mode = #tpu.pipeline_mode<synchronous>, transform_indices = @transform_3, window_bounds = array<i64: 16, 64>}, {transform_indices = @transform_4, window_bounds = array<i64: 1, 16, 16>}]} {
    %c0 = arith.constant 0 : index
    %c0_0 = arith.constant 0 : index
    %0 = vector.load %arg1[%c0, %c0_0] : memref<256x64xf32, #tpu.memory_space<vmem>>, vector<256x64xf32>
    %c0_1 = arith.constant 0 : index
    %c0_2 = arith.constant 0 : index
    %1 = vector.load %arg3[%c0_1, %c0_2] : memref<64x16xf32, #tpu.memory_space<vmem>>, vector<64x16xf32>
    %cst = arith.constant dense<0.000000e+00> : vector<256x16xf32>
    %2 = tpu.matmul %0, %1, %cst {dimension_numbers = #tpu.dot_dimension_numbers<[1], [0], [0], [1], [0, 0, 1, 1], [], []>} : vector<256x64xf32>, vector<64x16xf32>, vector<256x16xf32> -> vector<256x16xf32>
    %c0_3 = arith.constant 0 : index
    %c0_4 = arith.constant 0 : index
    %3 = vector.load %arg4[%c0_3, %c0_4] : memref<16x64xf32, #tpu.memory_space<vmem>>, vector<16x64xf32>
    %cst_5 = arith.constant 0.000000e+00 : f32
    %4 = vector.broadcast %cst_5 : f32 to vector<16x16xf32>
    %5 = vector.extract_strided_slice %2 {offsets = [0, 0], sizes = [64, 16], strides = [1, 1]} : vector<256x16xf32> to vector<64x16xf32>
    %cst_6 = arith.constant dense<0.000000e+00> : vector<16x16xf32>
    %6 = tpu.matmul %3, %5, %cst_6 {dimension_numbers = #tpu.dot_dimension_numbers<[1], [0], [0], [1], [0, 0, 1, 1], [], []>} : vector<16x64xf32>, vector<64x16xf32>, vector<16x16xf32> -> vector<16x16xf32>
    %c0_7 = arith.constant 0 : index
    %c0_8 = arith.constant 0 : index
    %c0_9 = arith.constant 0 : index
    %7 = vector.load %arg2[%c0_7, %c0_8, %c0_9] : memref<4x16x16xf32, #tpu.memory_space<vmem>>, vector<1x16x16xf32>
    %8 = vector.shape_cast %7 : vector<1x16x16xf32> to vector<16x16xf32>
    %9 = arith.subf %6, %8 : vector<16x16xf32>
    %10 = math.absf %9 : vector<16x16xf32>
    %11 = arith.addf %4, %10 : vector<16x16xf32>
    %12 = vector.extract_strided_slice %2 {offsets = [64, 0], sizes = [64, 16], strides = [1, 1]} : vector<256x16xf32> to vector<64x16xf32>
    %cst_10 = arith.constant dense<0.000000e+00> : vector<16x16xf32>
    %13 = tpu.matmul %3, %12, %cst_10 {dimension_numbers = #tpu.dot_dimension_numbers<[1], [0], [0], [1], [0, 0, 1, 1], [], []>} : vector<16x64xf32>, vector<64x16xf32>, vector<16x16xf32> -> vector<16x16xf32>
    %c1 = arith.constant 1 : index
    %c0_11 = arith.constant 0 : index
    %c0_12 = arith.constant 0 : index
    %14 = vector.load %arg2[%c1, %c0_11, %c0_12] : memref<4x16x16xf32, #tpu.memory_space<vmem>>, vector<1x16x16xf32>
    %15 = vector.shape_cast %14 : vector<1x16x16xf32> to vector<16x16xf32>
    %16 = arith.subf %13, %15 : vector<16x16xf32>
    %17 = math.absf %16 : vector<16x16xf32>
    %18 = arith.addf %11, %17 : vector<16x16xf32>
    %19 = vector.extract_strided_slice %2 {offsets = [128, 0], sizes = [64, 16], strides = [1, 1]} : vector<256x16xf32> to vector<64x16xf32>
    %cst_13 = arith.constant dense<0.000000e+00> : vector<16x16xf32>
    %20 = tpu.matmul %3, %19, %cst_13 {dimension_numbers = #tpu.dot_dimension_numbers<[1], [0], [0], [1], [0, 0, 1, 1], [], []>} : vector<16x64xf32>, vector<64x16xf32>, vector<16x16xf32> -> vector<16x16xf32>
    %c2 = arith.constant 2 : index
    %c0_14 = arith.constant 0 : index
    %c0_15 = arith.constant 0 : index
    %21 = vector.load %arg2[%c2, %c0_14, %c0_15] : memref<4x16x16xf32, #tpu.memory_space<vmem>>, vector<1x16x16xf32>
    %22 = vector.shape_cast %21 : vector<1x16x16xf32> to vector<16x16xf32>
    %23 = arith.subf %20, %22 : vector<16x16xf32>
    %24 = math.absf %23 : vector<16x16xf32>
    %25 = arith.addf %18, %24 : vector<16x16xf32>
    %26 = vector.extract_strided_slice %2 {offsets = [192, 0], sizes = [64, 16], strides = [1, 1]} : vector<256x16xf32> to vector<64x16xf32>
    %cst_16 = arith.constant dense<0.000000e+00> : vector<16x16xf32>
    %27 = tpu.matmul %3, %26, %cst_16 {dimension_numbers = #tpu.dot_dimension_numbers<[1], [0], [0], [1], [0, 0, 1, 1], [], []>} : vector<16x64xf32>, vector<64x16xf32>, vector<16x16xf32> -> vector<16x16xf32>
    %c3 = arith.constant 3 : index
    %c0_17 = arith.constant 0 : index
    %c0_18 = arith.constant 0 : index
    %28 = vector.load %arg2[%c3, %c0_17, %c0_18] : memref<4x16x16xf32, #tpu.memory_space<vmem>>, vector<1x16x16xf32>
    %29 = vector.shape_cast %28 : vector<1x16x16xf32> to vector<16x16xf32>
    %30 = arith.subf %27, %29 : vector<16x16xf32>
    %31 = math.absf %30 : vector<16x16xf32>
    %32 = arith.addf %25, %31 : vector<16x16xf32>
    %c0_19 = arith.constant 0 : index
    %c0_20 = arith.constant 0 : index
    %c0_21 = arith.constant 0 : index
    %33 = vector.load %arg5[%c0_19, %c0_20, %c0_21] : memref<1x16x16xf32, #tpu.memory_space<vmem>>, vector<1x16x16xf32>
    %34 = vector.shape_cast %33 : vector<1x16x16xf32> to vector<16x16xf32>
    %35 = vector.shape_cast %32 : vector<16x16xf32> to vector<1x16x16xf32>
    tpu.vector_store %arg5[%c0_19, %c0_20, %c0_21], %35 {strides = array<i32>} : memref<1x16x16xf32, #tpu.memory_space<vmem>>, vector<1x16x16xf32>,
    return
  }
  func.func @transform_0(%arg0: i32) -> (i32, i32) {
    %c0_i32 = arith.constant 0 : i32
    %c0_i32_0 = arith.constant 0 : i32
    return %arg0, %c0_i32 : i32, i32
  }
  func.func @transform_1(%arg0: i32) -> (i32, i32, i32) {
    %c0_i32 = arith.constant 0 : i32
    %c0_i32_0 = arith.constant 0 : i32
    %c0_i32_1 = arith.constant 0 : i32
    return %arg0, %c0_i32, %c0_i32_0 : i32, i32, i32
  }
  func.func @transform_2(%arg0: i32) -> (i32, i32) {
    %c0_i32 = arith.constant 0 : i32
    %c0_i32_0 = arith.constant 0 : i32
    %c0_i32_1 = arith.constant 0 : i32
    return %c0_i32, %c0_i32_0 : i32, i32
  }
  func.func @transform_3(%arg0: i32) -> (i32, i32) {
    %c0_i32 = arith.constant 0 : i32
    %c0_i32_0 = arith.constant 0 : i32
    %c0_i32_1 = arith.constant 0 : i32
    return %c0_i32, %c0_i32_0 : i32, i32
  }
  func.func @transform_4(%arg0: i32) -> (i32, i32, i32) {
    %c0_i32 = arith.constant 0 : i32
    %c0_i32_0 = arith.constant 0 : i32
    %c0_i32_1 = arith.constant 0 : i32
    return %arg0, %c0_i32, %c0_i32_0 : i32, i32, i32
  }
}

</mosaic_0001>

<bundles_post_ra>
// kernel: back_projection_loss.1
= control target key start
LH: loop header
LB: loop body
LE: loop exit
PB: predicated region body
PF: predicated region fallthrough
CT: control target
= control target key end

     0   :  { %9 = vsyncpa [#allocation3], 0  ;;  %s1392_s0 = inlined_call_operand.hbm [shape: f32[512,64], index: 0, kind: input, shape index: {}]   ;;  %s1393_s1 = inlined_call_operand.hbm [shape: f32[8,16,16], index: 1, kind: input, shape index: {}]   ;;  %s1394_s2 = inlined_call_operand.hbm [shape: f32[64,16], index: 2, kind: input, shape index: {}]   ;;  %s1395_s3 = inlined_call_operand.hbm [shape: f32[16,64], index: 3, kind: input, shape index: {}]   ;;  %s1396_s4 = inlined_call_operand.vmem [shape: f32[2,16,16], index: 4, kind: output, shape index: {}]  }
   0x1   :  { %11 = vsyncpa [#allocation3 + $0x1], 0 }
   0x2   :  { %12 = vsyncpa [#allocation5], 0 }
   0x3   :  { %14 = vsyncpa [#allocation5 + $0x1], 0 }
   0x4   :  { %15 = vsyncpa [#allocation8], 0  ;;  %s1154_s15 = smov 0   ;;  %s1156_s16 = smov 0  }
   0x5   :  { %s1158_s17 = smov 0   ;;  %s1160_s18 = smov 0  }
   0x6 LB: > { %s1173_s19 = sadd.s32 4294967295, %s1123_s18   ;;  %p41_p0 = scmp.ne.s32.totalorder %s1115_s16, %s1111_s15  ;;  %s1123_s18 = sphi %s1160_s18, %s1403_s18   ;;  %s1119_s17 = sphi %s1158_s17, %s1402_s17   ;;  %s1115_s16 = sphi %s1156_s16, %s1401_s16   ;;  %s1111_s15 = sphi %s1154_s15, %s1400_s15  }
   0x7   : > { %p42_p1 = scmp.eq.s32.totalorder %s1173_s19, 0  ;;  %p796_p2 = scmp.ge.s32.totalorder %s1123_s18, 1 }
   0x8   : > { %p146_p3 = scmp.lt.s32.totalorder %s1123_s18, 3  ;;  %s157_s23 = sshll.u32 %s1394_s2, 4  ;;  %s158_s23 = int_to_ptr.hbm [resolvable:$true] %s157_s23 }
   0x9   : > { %p1181_p4 = por %p42_p1, %p41_p0  ;;  %s1125_s25 = smov [#allocation6]  }
   0xa   : > { %p1188_p5 = pnand %p796_p2, %p146_p3  ;;  %s159_s26 = sshll.u32 %s1125_s25, 4  ;;  %s160_s26 = int_to_ptr.vmem [resolvable:$true] %s159_s26 }
   0xb   : > { %s171_s29 = sshll.u32 %s1395_s3, 4  ;;  %s1126_s30 = smov 128   ;;  %s172_s29 = int_to_ptr.hbm [resolvable:$true] %s171_s29 }
   0xc   : > { %p902_p6 = pneg %p1188_p5  ;;  %s1127_s5 = smov 8  }
   0xd   : > { %s1128_s6 = smov [#allocation7]   ;;  %s1206_s8 = sadd.s32 1, %s1123_s18  }
   0xe   : > { %p903_p7 = pnand %p902_p6, %p42_p1  ;;  %s173_s7 = sshll.u32 %s1128_s6, 4  ;;  %s174_s7 = int_to_ptr.vmem [resolvable:$true] %s173_s7 }
   0xf   : > { %s28_s9 = sadd.s32 1, %s1119_s17  ;;  %s25_s10 = ssub.s32 %s1123_s18, %s1206_s8 }
  0x10   : > { %905 = dma.hbm_to_vmem [thread:$0]  (!%p903_p7), %s158_s23, 1024, %s160_s26, [#allocation5], %s1126_s30, %s1126_s30, %s1127_s5  }
  0x11   : > { %908 = dma.hbm_to_vmem [thread:$0]  (!%p903_p7), %s172_s29, 256, %s174_s7, [#allocation8], %s1126_s30, %s1126_s30, %s1127_s5  }
  0x12   : > { %p35_p8 = scmp.ne.s32.totalorder %s1119_s17, %s1115_s16  ;;  %p26_p9 = scmp.eq.s32.totalorder %s25_s10, 0 }
  0x13   : > { %p36_p10 = scmp.eq.s32.totalorder %s1123_s18, 0  ;;  %p918_p11 = scmp.lt.s32.totalorder %s1123_s18, 2 }
  0x14   : > { %s1216_s11 = sand.u32 1, %s1119_s17   ;;  %s862_s14 = sshll.u32 %s1123_s18, 8 }
  0x15   : > { %s1219_s12 = scalar_select %p26_p9, %s1119_s17, %s28_s9  }
  0x16   : > { %p37_p12 = por %p36_p10, %p35_p8  ;;  %s800_s13 = sshll.u32 %s1216_s11, 8 }
  0x17   : > { %s196_s22 = scalar_lea.hbm %s1392_s0, %s862_s14  ;;  %s191_s25 = scalar_lea.vmem [#allocation2], %s800_s13 }
  0x18   : > { %s197_s23 = sshll.u32 %s196_s22, 4  ;;  %s199_s26 = sshll.u32 %s191_s25, 4  ;;  %s198_s23 = int_to_ptr.hbm [resolvable:$true] %s197_s23  ;;  %s200_s26 = int_to_ptr.vmem [resolvable:$true] %s199_s26 }
  0x19   : > { %p1226_p13 = pnand %p918_p11, %p37_p12  ;;  %s209_s28 = sand.u32 1, %s1123_s18  }
  0x1a   : > { %s803_s29 = sshll.u32 %s1216_s11, 6  ;;  %s188_s6 = scalar_lea.sflag [#allocation3], %s1216_s11 }
  0x1b   : > { %s1017_s7 = sshra.s32 %s198_s23, 4  ;;  %p1021_p2 = pneg %p1226_p13  ;;  %s1018_s7 = int_to_ptr.hbm [resolvable:$true] %s1017_s7 }
  0x1c   : > { %s1019_s9 = scalar_lea.hbm %s1018_s7, 256  ;;  %s1024_s14 = scalar_lea.hbm %s1392_s0, 512 }
  0x1d   : > { %p1020_p0 = scmp.ne.s32.totalorder %s1018_s7, %s1019_s9  ;;  %p1025_p7 = scmp.lt.s32.totalorder %s1018_s7, %s1392_s0 }
  0x1e   : > { %p1026_p8 = scmp.lt.s32.totalorder %s1024_s14, %s1019_s9 }
  0x1f   : > { %p1022_p3 = pnand %p1021_p2, %p1020_p0 }
  0x20   : > { %p1027_p9 = por %p1026_p8, %p1025_p7 }
  0x21   : > { %p1023_p6 = pneg %p1022_p3 }
  0x23   : > { %p1028_p10 = pnand %p1027_p9, %p1023_p6 }
  0x25   : > { %1031 = shalt.err (!%p1028_p10)
}
  0x26   : > { %912 = dma.hbm_to_vmem [thread:$0]  (!%p1226_p13), %s198_s23, 4096, %s200_s26, %s188_s6, %s1126_s30, %s1126_s30, %s1127_s5  }
  0x27   : > { %s864_s11 = sshll.u32 %s1123_s18, 6  ;;  %s213_s22 = scalar_lea.vmem [#allocation4], %s803_s29 }
  0x28   : > { %s222_s25 = sshll.u32 %s213_s22, 4  ;;  %s219_s15 = scalar_lea.hbm %s1393_s1, %s864_s11  ;;  %s223_s25 = int_to_ptr.vmem [resolvable:$true] %s222_s25 }
  0x29   : > { %s220_s7 = sshll.u32 %s219_s15, 4  ;;  %s210_s9 = scalar_lea.sflag [#allocation5], %s209_s28  ;;  %s221_s7 = int_to_ptr.hbm [resolvable:$true] %s220_s7 }
  0x2a   : > { %s1047_s14 = sshra.s32 %s221_s7, 4  ;;  %s1054_s26 = scalar_lea.hbm %s1393_s1, 128  ;;  %s1048_s14 = int_to_ptr.hbm [resolvable:$true] %s1047_s14 }
  0x2b   : > { %s1049_s21 = scalar_lea.hbm %s1048_s14, 64  ;;  %p1055_p3 = scmp.lt.s32.totalorder %s1048_s14, %s1393_s1 }
  0x2c   : > { %p1050_p11 = scmp.ne.s32.totalorder %s1048_s14, %s1049_s21  ;;  %p1056_p6 = scmp.lt.s32.totalorder %s1054_s26, %s1049_s21 }
  0x2e   : > { %p1052_p12 = pnand %p1050_p11, %p1021_p2  ;;  %p1057_p7 = por %p1056_p6, %p1055_p3 }
  0x30   : > { %p1053_p0 = pneg %p1052_p12 }
  0x32   : > { %p1058_p8 = pnand %p1057_p7, %p1053_p0 }
  0x34   : > { %1061 = shalt.err (!%p1058_p8)
}
  0x35   : > { %915 = dma.hbm_to_vmem [thread:$0]  (!%p1226_p13), %s221_s7, 1024, %s223_s25, %s210_s9, %s1126_s30, %s1126_s30, %s1127_s5  }
  0x36   : > { %234 = sbr.rel (%p1188_p5) target bundleno = 437 (0x1b5), region = 36  ;;  %s236_s28 = sand.u32 (!%p1188_p5), 1, %s1115_s16  }
  0x37   : > { %s808_s11 = sshll.u32 (!%p1188_p5), %s236_s28, 8  ;;  %s237_s22 = scalar_lea.sflag (!%p1188_p5), [#allocation3], %s236_s28 }
  0x38   : > { %s1270_s10 = scalar_lea.vmem (!%p1188_p5), [#allocation2], %s808_s11 }
  0x3b   : > { %1094 = dma.done.wait (%p1181_p4), %s237_s22, 4096  }
  0x3c   : > { %1096 = vsyncadd (%p1181_p4), %s237_s22, 4294963200  ;;  %s246_s27 = sand.u32 1, %s1173_s19   ;;  %s809_s13 = sshll.u32 %s236_s28, 6 }
  0x3d   : > { %s247_s30 = scalar_lea.sflag [#allocation5], %s246_s27  ;;  %s1277_s5 = scalar_lea.vmem [#allocation4], %s809_s13 }
  0x3e   : > { %1098 = dma.done.wait (%p1181_p4), %s247_s30, 1024  }
  0x3f   : > { %1100 = vsyncadd (%p1181_p4), %s247_s30, 4294966272 }
  0x40   : > { %1102 = dma.done.wait (%p42_p1), [#allocation5], 1024  }
  0x41   : > { %1104 = vsyncadd (%p42_p1), [#allocation5], 4294966272 }
  0x42   : > { %1106 = dma.done.wait (%p42_p1), [#allocation8], 256  }
  0x43   : > { %1108 = vsyncadd (%p42_p1), [#allocation8], 4294967040  ;;  %v337_v0 = vld [vmem:[#allocation6 + $0x38] sm:$0xff]  ;;  %v336_v1 = vld [vmem:[#allocation6 + $0x30] sm:$0xff]  ;;  %vm338_vm0 = vcmask 523264   ;;  %p293_p1 = scmp.lt.s32.totalorder %s1173_s19, 1 }
  0x44   : > { %443 = vmatpush.msra.mxu0 %v337_v0  ;;  %866 = vmatpush.msra.mxu1 %v337_v0  ;;  %v335_v2 = vld [vmem:[#allocation6 + $0x28] sm:$0xff]  ;;  %v334_v3 = vld [vmem:[#allocation6 + $0x20] sm:$0xff]  ;;  %v333_v4 = vld [vmem:[#allocation6 + $0x18] sm:$0xff]  ;;  %vm683_vm1 = vcmask 130048  }
  0x45   : > { %867 = vmatpush.msra.mxu2 %v337_v0  ;;  %868 = vmatpush.msra.mxu3 %v337_v0  ;;  %v332_v5 = vld [vmem:[#allocation6 + $0x10] sm:$0xff]  ;;  %v331_v6 = vld [vmem:[#allocation6 + $0x8] sm:$0xff]  ;;  %v330_v7 = vld [vmem:[#allocation6] sm:$0xff]  ;;  %s1405_s19 = smov (!%p293_p1, %s1173_s19), 1 }
  0x46   : > { %444 = vmatpush.msra.mxu0 %v336_v1  ;;  %869 = vmatpush.msra.mxu1 %v336_v1  ;;  %v298_v8 = vld [vmem:[%s1270_s10] sm:$0xff]  ;;  %v308_v9 = vld [vmem:[%s1270_s10 + $0x50] sm:$0xff]  ;;  %v299_v12 = vld [vmem:[%s1270_s10 + $0x8] sm:$0xff]  ;;  %s865_s20 = sshll.u32 %s1405_s19, 4 }
  0x47   : > { %870 = vmatpush.msra.mxu2 %v336_v1  ;;  %871 = vmatpush.msra.mxu3 %v336_v1  ;;  %v314_v10 = vld [vmem:[%s1270_s10 + $0x80] sm:$0xff]  ;;  %v309_v13 = vld [vmem:[%s1270_s10 + $0x58] sm:$0xff]  ;;  %v315_v14 = vld [vmem:[%s1270_s10 + $0x88] sm:$0xff]  ;;  %s297_s15 = scalar_lea.vmem %s1396_s4, %s865_s20 }
  0x48   : > { %445 = vmatpush.msra.mxu0 %v335_v2  ;;  %872 = vmatpush.msra.mxu1 %v335_v2  ;;  %v322_v11 = vld [vmem:[%s1270_s10 + $0xc0] sm:$0xff]  ;;  %v323_v15 = vld [vmem:[%s1270_s10 + $0xc8] sm:$0xff]  ;;  %v300_v16 = vld [vmem:[%s1270_s10 + $0x10] sm:$0xff] }
  0x49   : > { %873 = vmatpush.msra.mxu2 %v335_v2  ;;  %874 = vmatpush.msra.mxu3 %v335_v2  ;;  %v310_v17 = vld [vmem:[%s1270_s10 + $0x60] sm:$0xff]  ;;  %v316_v18 = vld [vmem:[%s1270_s10 + $0x90] sm:$0xff]  ;;  %v301_v20 = vld [vmem:[%s1270_s10 + $0x18] sm:$0xff] }
  0x4a   : > { %446 = vmatpush.msra.mxu0 %v334_v3  ;;  %875 = vmatpush.msra.mxu1 %v334_v3  ;;  %v324_v19 = vld [vmem:[%s1270_s10 + $0xd0] sm:$0xff]  ;;  %v311_v21 = vld [vmem:[%s1270_s10 + $0x68] sm:$0xff]  ;;  %v317_v22 = vld [vmem:[%s1270_s10 + $0x98] sm:$0xff] }
  0x4b   : > { %876 = vmatpush.msra.mxu2 %v334_v3  ;;  %877 = vmatpush.msra.mxu3 %v334_v3  ;;  %v325_v23 = vld [vmem:[%s1270_s10 + $0xd8] sm:$0xff]  ;;  %v302_v24 = vld [vmem:[%s1270_s10 + $0x20] sm:$0xff]  ;;  %v312_v25 = vld [vmem:[%s1270_s10 + $0x70] sm:$0xff] }
  0x4c   : > { %447 = vmatpush.msra.mxu0 %v333_v4  ;;  %878 = vmatpush.msra.mxu1 %v333_v4  ;;  %v318_v26 = vld [vmem:[%s1270_s10 + $0xa0] sm:$0xff]  ;;  %v303_v28 = vld [vmem:[%s1270_s10 + $0x28] sm:$0xff]  ;;  %v313_v29 = vld [vmem:[%s1270_s10 + $0x78] sm:$0xff] }
  0x4d   : > { %879 = vmatpush.msra.mxu2 %v333_v4  ;;  %880 = vmatpush.msra.mxu3 %v333_v4  ;;  %v326_v27 = vld [vmem:[%s1270_s10 + $0xe0] sm:$0xff]  ;;  %v319_v30 = vld [vmem:[%s1270_s10 + $0xa8] sm:$0xff]  ;;  %v304_v32 = vld [vmem:[%s1270_s10 + $0x30] sm:$0xff] }
  0x4e   : > { %448 = vmatpush.msra.mxu0 %v332_v5  ;;  %881 = vmatpush.msra.mxu1 %v332_v5  ;;  %v327_v31 = vld [vmem:[%s1270_s10 + $0xe8] sm:$0xff]  ;;  %v320_v33 = vld [vmem:[%s1270_s10 + $0xb0] sm:$0xff]  ;;  %v305_v35 = vld [vmem:[%s1270_s10 + $0x38] sm:$0xff] }
  0x4f   : > { %882 = vmatpush.msra.mxu2 %v332_v5  ;;  %883 = vmatpush.msra.mxu3 %v332_v5  ;;  %v328_v34 = vld [vmem:[%s1270_s10 + $0xf0] sm:$0xff]  ;;  %v321_v36 = vld [vmem:[%s1270_s10 + $0xb8] sm:$0xff]  ;;  %v306_v38 = vld [vmem:[%s1270_s10 + $0x40] sm:$0xff] }
  0x50   : > { %449 = vmatpush.msra.mxu0 %v331_v6  ;;  %884 = vmatpush.msra.mxu1 %v331_v6  ;;  %v329_v37 = vld [vmem:[%s1270_s10 + $0xf8] sm:$0xff]  ;;  %v307_v39 = vld [vmem:[%s1270_s10 + $0x48] sm:$0xff] }
  0x51   : > { %885 = vmatpush.msra.mxu2 %v331_v6  ;;  %886 = vmatpush.msra.mxu3 %v331_v6 }
  0x52   : > { %450 = vmatpush.msra.mxu0 %v330_v7  ;;  %887 = vmatpush.msra.mxu1 %v330_v7 }
  0x53   : > { %888 = vmatpush.msra.mxu2 %v330_v7  ;;  %814 = vmatmul.msk.f32.vlgmr.msra.gmra.mxu0 %vm338_vm0, %v298_v8 }
  0x54   : > { %824 = vmatmul.msk.f32.vlgmr.msra.gmra.mxu1 %vm338_vm0, %v308_v9  ;;  %830 = vmatmul.msk.f32.vlgmr.msra.gmra.mxu2 %vm338_vm0, %v314_v10  ;;  %v549_v9 = vld [vmem:[#allocation7 + $0x8] sm:$0xff] }
  0x55   : > { %889 = vmatpush.msra.mxu3 %v330_v7  ;;  %v548_v7 = vld [vmem:[#allocation7] sm:$0xff] }
  0x56   : > { %838 = vmatmul.msk.f32.vlgmr.msra.gmra.mxu3 %vm338_vm0, %v322_v11  ;;  %v579_v11 = vld [vmem:[%s1277_s5] sm:$0xff] }
  0x5b   : > { %815 = vmatmul.msk.f32.gmra.mxu0 %vm338_vm0, %v299_v12 }
  0x5c   : > { %825 = vmatmul.msk.f32.gmra.mxu1 %vm338_vm0, %v309_v13  ;;  %831 = vmatmul.msk.f32.gmra.mxu2 %vm338_vm0, %v315_v14  ;;  %v850_v13 = vld [vmem:[%s1277_s5 + $0x10] sm:$0xff] }
  0x5e   : > { %839 = vmatmul.msk.f32.gmra.mxu3 %vm338_vm0, %v323_v15 }
  0x63   : > { %816 = vmatmul.msk.f32.gmra.mxu0 %vm338_vm0, %v300_v16  ;;  %v854_v16 = vld [vmem:[%s1277_s5 + $0x20] sm:$0xff] }
  0x64   : > { %826 = vmatmul.msk.f32.gmra.mxu1 %vm338_vm0, %v310_v17  ;;  %832 = vmatmul.msk.f32.gmra.mxu2 %vm338_vm0, %v316_v18 }
  0x66   : > { %840 = vmatmul.msk.f32.gmra.mxu3 %vm338_vm0, %v324_v19 }
  0x6b   : > { %817 = vmatmul.msk.f32.gmra.mxu0 %vm338_vm0, %v301_v20 }
  0x6c   : > { %827 = vmatmul.msk.f32.gmra.mxu1 %vm338_vm0, %v311_v21  ;;  %833 = vmatmul.msk.f32.gmra.mxu2 %vm338_vm0, %v317_v22  ;;  %v580_v22 = vld [vmem:[%s1277_s5 + $0x8] sm:$0xff] }
  0x6e   : > { %841 = vmatmul.msk.f32.gmra.mxu3 %vm338_vm0, %v325_v23  ;;  %v858_v23 = vld [vmem:[%s1277_s5 + $0x30] sm:$0xff] }
  0x73   : > { %818 = vmatmul.msk.f32.gmra.mxu0 %vm338_vm0, %v302_v24 }
  0x74   : > { %828 = vmatmul.msk.f32.gmra.mxu1 %vm338_vm0, %v312_v25  ;;  %834 = vmatmul.msk.f32.gmra.mxu2 %vm338_vm0, %v318_v26 }
  0x76   : > { %842 = vmatmul.msk.f32.gmra.mxu3 %vm338_vm0, %v326_v27  ;;  %v851_v27 = vld [vmem:[%s1277_s5 + $0x18] sm:$0xff] }
  0x7b   : > { %819 = vmatmul.msk.f32.gmra.mxu0 %vm338_vm0, %v303_v28 }
  0x7c   : > { %829 = vmatmul.msk.f32.gmra.mxu1 %vm338_vm0, %v313_v29  ;;  %835 = vmatmul.msk.f32.gmra.mxu2 %vm338_vm0, %v319_v30 }
  0x7e   : > { %843 = vmatmul.msk.f32.gmra.mxu3 %vm338_vm0, %v327_v31  ;;  %v855_v31 = vld [vmem:[%s1277_s5 + $0x28] sm:$0xff] }
  0x83   : > { %820 = vmatmul.msk.f32.gmra.mxu0 %vm338_vm0, %v304_v32 }
  0x84   : > { %836 = vmatmul.msk.f32.gmra.mxu2 %vm338_vm0, %v320_v33 }
  0x86   : > { %844 = vmatmul.msk.f32.gmra.mxu3 %vm338_vm0, %v328_v34 }
  0x8b   : > { %821 = vmatmul.msk.f32.gmra.mxu0 %vm338_vm0, %v305_v35 }
  0x8c   : > { %837 = vmatmul.msk.f32.gmra.mxu2 %vm338_vm0, %v321_v36 }
  0x8e   : > { %845 = vmatmul.msk.f32.gmra.mxu3 %vm338_vm0, %v329_v37 }
  0x93   : > { %822 = vmatmul.msk.f32.gmra.mxu0 %vm338_vm0, %v306_v38 }
  0x9b   : > { %823 = vmatmul.msk.f32.gmra.mxu0 %vm338_vm0, %v307_v39 }
  0xd0   : > { %v452_v40 = vpop.f32.mrf.mxu0 }
  0xd1   : > { %v482_v41 = vpop.f32.mrf.mxu1 }
  0xd7   : > { %v500_v42 = vpop.f32.mrf.mxu2 }
  0xd8   : > { %v455_v43 = vpop.f32.mrf.mxu0 }
  0xd9   : > { %v485_v44 = vpop.f32.mrf.mxu1  ;;  %v1355_v45 = vpop.f32.mrf.mxu3 }
  0xdf   : > { %v503_v46 = vpop.f32.mrf.mxu2 }
  0xe0   : > { %v458_v47 = vpop.f32.mrf.mxu0 }
  0xe1   : > { %v488_v48 = vpop.f32.mrf.mxu1  ;;  %v527_v49 = vpop.f32.mrf.mxu3 }
  0xe7   : > { %v506_v50 = vpop.f32.mrf.mxu2 }
  0xe8   : > { %v461_v51 = vpop.f32.mrf.mxu0 }
  0xe9   : > { %v491_v52 = vpop.f32.mrf.mxu1  ;;  %v530_v53 = vpop.f32.mrf.mxu3 }
  0xef   : > { %v509_v54 = vpop.f32.mrf.mxu2 }
  0xf0   : > { %v464_v55 = vpop.f32.mrf.mxu0 }
  0xf1   : > { %v494_v56 = vpop.f32.mrf.mxu1  ;;  %v533_v57 = vpop.f32.mrf.mxu3 }
  0xf7   : > { %v512_v58 = vpop.f32.mrf.mxu2 }
  0xf8   : > { %v467_v59 = vpop.f32.mrf.mxu0 }
  0xf9   : > { %v497_v60 = vpop.f32.mrf.mxu1  ;;  %v536_v61 = vpop.f32.mrf.mxu3 }
  0xfa   : > { %595 = vmatpush.msrb.mxu2 %v497_v60 }
  0xfc   : > { %596 = vmatpush.msrb.mxu2 %v494_v56 }
  0xfe   : > { %597 = vmatpush.msrb.mxu2 %v491_v52 }
  0xff   : > { %v515_v62 = vpop.f32.mrf.mxu2 }
 0x100   : > { %598 = vmatpush.msrb.mxu2 %v488_v48  ;;  %v470_v63 = vpop.f32.mrf.mxu0 }
 0x101   : > { %v539_v0 = vpop.f32.mrf.mxu3 }
 0x102   : > { %599 = vmatpush.msrb.mxu2 %v485_v44 }
 0x104   : > { %600 = vmatpush.msrb.mxu2 %v482_v41 }
 0x107   : > { %v518_v1 = vpop.f32.mrf.mxu2 }
 0x108   : > { %v473_v2 = vpop.f32.mrf.mxu0 }
 0x109   : > { %564 = vmatpush.msrb.mxu1 %v473_v2  ;;  %v542_v3 = vpop.f32.mrf.mxu3 }
 0x10b   : > { %565 = vmatpush.msrb.mxu1 %v470_v63 }
 0x10d   : > { %566 = vmatpush.msrb.mxu1 %v467_v59 }
 0x10f   : > { %v521_v4 = vpop.f32.mrf.mxu2  ;;  %567 = vmatpush.msrb.mxu1 %v464_v55 }
 0x110   : > { %627 = vmatpush.msrb.mxu3 %v521_v4  ;;  %v476_v5 = vpop.f32.mrf.mxu0 }
 0x111   : > { %568 = vmatpush.msrb.mxu1 %v461_v51  ;;  %v545_v6 = vpop.f32.mrf.mxu3 }
 0x112   : > { %628 = vmatpush.msrb.mxu3 %v518_v1 }
 0x113   : > { %569 = vmatpush.msrb.mxu1 %v458_v47 }
 0x114   : > { %629 = vmatpush.msrb.mxu3 %v515_v62 }
 0x115   : > { %570 = vmatpush.msrb.mxu1 %v455_v43 }
 0x116   : > { %630 = vmatpush.msrb.mxu3 %v512_v58 }
 0x117   : > { %571 = vmatpush.msrb.mxu1 %v452_v40  ;;  %v859_v40 = vld [vmem:[%s1277_s5 + $0x38] sm:$0xff] }
 0x118   : > { %631 = vmatpush.msrb.mxu3 %v509_v54  ;;  %v479_v8 = vpop.f32.mrf.mxu0  ;;  %846 = vmatmul.msk.f32.vlgmr.msrb.gmra.mxu1 %vm338_vm0, %v548_v7 }
 0x119   : > { %659 = vmatpush.msra.mxu1 %v545_v6  ;;  %601 = vmatpush.msrb.mxu2 %v479_v8 }
 0x11a   : > { %632 = vmatpush.msrb.mxu3 %v506_v50 }
 0x11b   : > { %660 = vmatpush.msra.mxu1 %v542_v3  ;;  %602 = vmatpush.msrb.mxu2 %v476_v5 }
 0x11c   : > { %633 = vmatpush.msrb.mxu3 %v503_v46  ;;  %848 = vmatmul.msk.f32.vlgmr.msrb.gmra.mxu2 %vm338_vm0, %v548_v7 }
 0x11d   : > { %661 = vmatpush.msra.mxu1 %v539_v0 }
 0x11e   : > { %634 = vmatpush.msrb.mxu3 %v500_v42 }
 0x11f   : > { %662 = vmatpush.msra.mxu1 %v536_v61  ;;  %852 = vmatmul.msk.f32.vlgmr.msrb.gmra.mxu3 %vm338_vm0, %v548_v7 }
 0x120   : > { %847 = vmatmul.msk.f32.gmra.mxu1 %vm338_vm0, %v549_v9 }
 0x121   : > { %663 = vmatpush.msra.mxu1 %v533_v57 }
 0x123   : > { %664 = vmatpush.msra.mxu1 %v530_v53 }
 0x124   : > { %849 = vmatmul.msk.f32.gmra.mxu2 %vm338_vm0, %v549_v9 }
 0x125   : > { %665 = vmatpush.msra.mxu1 %v527_v49 }
 0x127   : > { %666 = vmatpush.msra.mxu1 %v1355_v45  ;;  %853 = vmatmul.msk.f32.gmra.mxu3 %vm338_vm0, %v549_v9 }
 0x128   : > { %856 = vmatmul.msk.f32.vlgmr.msra.gmra.mxu1 %vm338_vm0, %v548_v7 }
 0x130   : > { %857 = vmatmul.msk.f32.gmra.mxu1 %vm338_vm0, %v549_v9 }
 0x195   : > { %v573_v10 = vpop.f32.mrf.mxu1 }
 0x196   : > { %v581_v14 = vsub.f32 %v573_v10, %v579_v11 }
 0x198   : > { %v583_v19 = vand.u32 2147483647, %v581_v14 }
 0x19d   : > { %v576_v12 = vpop.f32.mrf.mxu1 }
 0x19e   : > { %v582_v28 = vsub.f32 %v576_v12, %v580_v22 }
 0x19f   : > { %v604_v15 = vpop.f32.mrf.mxu2 }
 0x1a0   : > { %v613_v17 = vsub.f32 %v604_v15, %v850_v13  ;;  %v584_v36 = vand.u32 2147483647, %v582_v28 }
 0x1a2   : > { %v636_v18 = vpop.f32.mrf.mxu3  ;;  %v615_v20 = vand.u32 2147483647, %v613_v17 }
 0x1a3   : > { %v645_v21 = vsub.f32 %v636_v18, %v854_v16 }
 0x1a4   : > { %v617_v24 = vadd.f32 %v615_v20, %v583_v19 }
 0x1a5   : > { %v647_v25 = vand.u32 2147483647, %v645_v21  ;;  %v668_v26 = vpop.f32.mrf.mxu1 }
 0x1a6   : > { %v677_v29 = vsub.f32 %v668_v26, %v858_v23 }
 0x1a7   : > { %v607_v30 = vpop.f32.mrf.mxu2  ;;  %v649_v32 = vadd.f32 %v647_v25, %v617_v24 }
 0x1a8   : > { %v679_v33 = vand.u32 2147483647, %v677_v29  ;;  %v614_v34 = vsub.f32 %v607_v30, %v851_v27 }
 0x1aa   : > { %v639_v35 = vpop.f32.mrf.mxu3  ;;  %v681_v37 = vadd.f32 %v679_v33, %v649_v32  ;;  %v616_v38 = vand.u32 2147483647, %v614_v34 }
 0x1ab   : > { %v646_v39 = vsub.f32 %v639_v35, %v855_v31 }
 0x1ac   : > { %684 = vst.msk [vmem:[%s297_s15] sm:$0xff] %vm683_vm1, %v681_v37  ;;  %v618_v41 = vadd.f32 %v616_v38, %v584_v36 }
 0x1ad   : > { %v648_v42 = vand.u32 2147483647, %v646_v39  ;;  %v671_v43 = vpop.f32.mrf.mxu1 }
 0x1ae   : > { %v678_v44 = vsub.f32 %v671_v43, %v859_v40 }
 0x1af   : > { %v650_v45 = vadd.f32 %v648_v42, %v618_v41 }
 0x1b0   : > { %v680_v46 = vand.u32 2147483647, %v678_v44 }
 0x1b2   : > { %v682_v47 = vadd.f32 %v680_v46, %v650_v45 }
 0x1b4   : > { %685 = vst.msk [vmem:[%s297_s15 + $0x8] sm:$0xff] %vm683_vm1, %v682_v47 }
 0x1b5 PF: > { %p18_p4 = scmp.ge.s32.totalorder %s1206_s8, 4   ;;  %s1400_s15 = smov %s1115_s16 }
 0x1b6   : > { %s1401_s16 = smov %s1119_s17  ;;  %s1402_s17 = smov %s1219_s12 }
 0x1b7   : > { %s1403_s18 = smov %s1206_s8  ;;  %20 = sbr.rel (!%p18_p4) target bundleno = 6 (0x6), region = 100 }
 0x1bc   :  { %707 = vsyncpa [#allocation3], 1 }
 0x1bd   :  { %709 = vsyncpa [#allocation3 + $0x1], 1 }
 0x1be   :  { %710 = vsyncpa [#allocation5], 1 }
 0x1bf   :  { %712 = vsyncpa [#allocation5 + $0x1], 1 }
 0x1c0   :  { %713 = vsyncpa [#allocation8], 1 }

</bundles_post_ra>
